<compile_context>
chip_gen: v6e
topology: v6e:2x2x1
jax: 0.10.0
libtpu: 0.0.40
codegen_flags: <defaults>
</compile_context>

<pallas_src>
import jax
import jax.numpy as jnp
from jax.experimental import pallas as pl
from jax.experimental.pallas import tpu as pltpu

_LANE = 128


def _sublane_multiple(dtype) -> int:
    return {4: 8, 2: 16, 1: 32}.get(jnp.dtype(dtype).itemsize, 8)


def _round_up(x: int, m: int) -> int:
    return ((x + m - 1) // m) * m


def _ce_kernel(logits_ref, targets_ref, nll_ref, corr_ref, m_sc, l_sc, t_sc):
    """One (TB, TC) tile of an online cross-entropy + accuracy reduction.

    logits_ref : VMEM (TB, TC) float   (input dtype; upcast per block)
    targets_ref: VMEM (TB, 1)  int32
    nll_ref    : VMEM (TB, 1)  f32     per-row NLL      (written at last class tile)
    corr_ref   : VMEM (TB, 1)  f32     per-row correct  (written at last class tile)
    m_sc/l_sc/t_sc : VMEM (TB, 1) f32  running max / sum-exp / target logit
    """
    c = pl.program_id(1)
    nc = pl.num_programs(1)
    tb, tc = logits_ref.shape

    @pl.when(c == 0)
    def _():
        m_sc[...] = jnp.full_like(m_sc, -jnp.inf)
        l_sc[...] = jnp.zeros_like(l_sc)
        t_sc[...] = jnp.zeros_like(t_sc)

    x = logits_ref[...].astype(jnp.float32)          # (TB, TC) upcast in-kernel only
    tgt = targets_ref[...]                           # (TB, 1) int32

    # --- online (flash-style) logsumexp over the class axis -------------------
    tile_max = jnp.max(x, axis=-1, keepdims=True)                       # (TB, 1)
    m_new = jnp.maximum(m_sc[...], tile_max)
    alpha = jnp.exp(m_sc[...] - m_new)               # 0 at c==0 (m_sc = -inf)
    l_new = alpha * l_sc[...] + jnp.sum(jnp.exp(x - m_new), axis=-1, keepdims=True)

    # --- target logit: exactly one class tile contains it; others add 0 -------
    # Compare a class-tile-local iota (lane index) against the per-row local
    # target column (tgt - c*tc): only the per-row (TB,1) column is offset, the
    # full (TB,TC) iota never needs the +c*tc add.
    cls_local = jax.lax.broadcasted_iota(jnp.int32, (tb, tc), 1)
    tgt_local = tgt - c * tc
    t_new = t_sc[...] + jnp.sum(
        jnp.where(cls_local == tgt_local, x, 0.0), axis=-1, keepdims=True)

    m_sc[...] = m_new
    l_sc[...] = l_new
    t_sc[...] = t_new

    @pl.when(c == nc - 1)
    def _():
        nll_ref[...] = (jnp.log(l_new) + m_new) - t_new
        # Per-row scalar test (no full-tile compare/mask/reduce needed).
        # TODO(synk): torch.argmax breaks ties by first index; here a row whose
        # target logit exactly ties the row max counts as correct (measure-zero
        # for real-valued logits, but semantics differ on exact ties).
        corr_ref[...] = (t_new >= m_new).astype(jnp.float32)


@jax.jit
def classification_loss_and_accuracy(logits, targets):
    """Single fused pass over logits -> (mean cross-entropy loss, accuracy in %).

    logits : (B, C) float (f32/bf16); targets : (B,) integer class ids.
    """
    B, C = logits.shape
    dtype = logits.dtype
    itemsize = jnp.dtype(dtype).itemsize
    sub = _sublane_multiple(dtype)

    # ---- tile selection -------------------------------------------------------
    # Class tile: full (lane-padded) C if small, else 2048-lane chunks (the online
    # LSE handles multiple class tiles).  Batch tile: largest sublane multiple
    # keeping one logits tile <= ~2 MiB, so 2x double-buffering stays well inside
    # the default scoped VMEM on every generation (incl. v7x's 64 MiB physical).
    tc = min(_round_up(C, _LANE), 2048)
    tile_budget = 2 * 1024 * 1024
    tb = max(sub, (tile_budget // (tc * itemsize)) // sub * sub)
    tb = min(tb, _round_up(B, sub), 1024)

    b_pad = _round_up(B, tb)
    c_pad = _round_up(C, tc)
    nb, nc = b_pad // tb, c_pad // tc

    # Pad classes with the most-negative finite value (exp underflows to 0, never
    # becomes the row max); padded batch rows produce finite garbage that is
    # sliced off below.
    neg = jnp.finfo(dtype).min
    logits_p = jnp.pad(logits, ((0, b_pad - B), (0, c_pad - C)), constant_values=neg)
    targets_p = jnp.pad(targets.astype(jnp.int32), (0, b_pad - B)).reshape(b_pad, 1)

    nll_rows, corr_rows = pl.pallas_call(
        _ce_kernel,
        out_shape=(
            jax.ShapeDtypeStruct((b_pad, 1), jnp.float32),
            jax.ShapeDtypeStruct((b_pad, 1), jnp.float32),
        ),
        grid_spec=pltpu.PrefetchScalarGridSpec(
            num_scalar_prefetch=0,
            grid=(nb, nc),
            in_specs=[
                pl.BlockSpec((tb, tc), lambda b, c: (b, c)),
                pl.BlockSpec((tb, 1), lambda b, c: (b, 0)),
            ],
            out_specs=(
                pl.BlockSpec((tb, 1), lambda b, c: (b, 0)),
                pl.BlockSpec((tb, 1), lambda b, c: (b, 0)),
            ),
            scratch_shapes=[
                pltpu.VMEM((tb, 1), jnp.float32),  # running max
                pltpu.VMEM((tb, 1), jnp.float32),  # running sum-exp
                pltpu.VMEM((tb, 1), jnp.float32),  # running target logit
            ],
        ),
        compiler_params=pltpu.CompilerParams(
            # Batch tiles are independent (per-row partial outputs) -> can be
            # megacore-sharded; class axis carries the running LSE state.
            dimension_semantics=("parallel", "arbitrary"),
        ),
    )(logits_p, targets_p)

    nll = nll_rows[:B, 0]
    correct = corr_rows[:B, 0]
    inv_b = 1.0 / jnp.float32(B)
    loss = jnp.sum(nll) * inv_b
    acc = 100.0 * jnp.sum(correct) * inv_b
    return loss, acc


class ClassificationLossJAX:
    """JAX mirror of PyTorch ClassificationLoss (CrossEntropyLoss concrete case).

    forward() and get_accuracy() share ONE fused Pallas pass over the logits; the
    (loss, acc) pair is cached per (outputs, targets) object pair so the logits
    are streamed from HBM only once even when both quantities are queried.
    """

    def __init__(self):
        self._cache_key = None
        self._cache_val = None

    def _loss_and_acc(self, targets, outputs):
        # NOTE: id()-based cache assumes the caller keeps the arrays alive between
        # forward() and get_accuracy() (true for the training-loop usage pattern).
        key = (id(outputs), id(targets))
        if key != self._cache_key:
            self._cache_val = classification_loss_and_accuracy(outputs, targets)
            self._cache_key = key
        return self._cache_val

    def forward(self, targets, *outputs):
        loss, _ = self._loss_and_acc(targets, outputs[0])
        return loss

    __call__ = forward

    def get_accuracy(self, targets, *outputs):
        _, acc = self._loss_and_acc(targets, outputs[0])
        return float(acc)


if __name__ == "__main__":
    key = jax.random.PRNGKey(0)
    criterion = ClassificationLossJAX()

    # Two small shapes: one aligned, one that exercises batch/class padding.
    for (B, C) in [(8, 32), (13, 100)]:
        k1, k2, key = jax.random.split(key, 3)
        logits = jax.random.normal(k1, (B, C), dtype=jnp.float32)
        targets = jax.random.randint(k2, (B,), 0, C, dtype=jnp.int32)

        loss = criterion(targets, logits)                # Pallas kernel (single pass)
        acc = criterion.get_accuracy(targets, logits)    # cached -> no 2nd HBM read
        jax.block_until_ready(loss)

        # pure-JAX reference (cross-entropy mean reduction + argmax accuracy)
        logp = jax.nn.log_softmax(logits, axis=-1)
        ref_loss = -jnp.mean(logp[jnp.arange(B), targets])
        ref_acc = 100.0 * jnp.mean(
            (jnp.argmax(logits, axis=-1) == targets).astype(jnp.float32))
        assert jnp.allclose(loss, ref_loss, atol=1e-5, rtol=1e-5), (loss, ref_loss)
        assert abs(acc - float(ref_acc)) < 1e-4, (acc, ref_acc)
        assert 0.0 <= acc <= 100.0

    print("KERNEL_OK")
</pallas_src>

<mosaic_0001>
module attributes {stable_mosaic.version = 11 : i64} {
  func.func @_ce_kernel(%arg0: i32, %arg1: i32, %arg2: memref<8x128xf32, #tpu.memory_space<vmem>>, %arg3: memref<8x1xi32, #tpu.memory_space<vmem>>, %arg4: memref<8x1xf32, #tpu.memory_space<vmem>>, %arg5: memref<8x1xf32, #tpu.memory_space<vmem>>, %arg6: memref<8x1xf32, #tpu.memory_space<vmem>>, %arg7: memref<8x1xf32, #tpu.memory_space<vmem>>, %arg8: memref<8x1xf32, #tpu.memory_space<vmem>>) attributes {dimension_semantics = [#tpu.dimension_semantics<parallel>, #tpu.dimension_semantics<arbitrary>], iteration_bounds = array<i64: 1, 1>, scalar_prefetch = 0 : i64, scratch_operands = 3 : i64, tpu.core_type = #tpu.core_type<tc>, window_params = [{transform_indices = @transform_0, window_bounds = array<i64: 8, 128>}, {transform_indices = @transform_1, window_bounds = array<i64: 8, 1>}, {transform_indices = @transform_2, window_bounds = array<i64: 8, 1>}, {transform_indices = @transform_3, window_bounds = array<i64: 8, 1>}]} {
    %c0_i32 = arith.constant 0 : i32
    %0 = arith.cmpi eq, %arg1, %c0_i32 : i32
    %1 = arith.extui %0 : i1 to i32
    %c0_i32_0 = arith.constant 0 : i32
    %2 = arith.cmpi ne, %1, %c0_i32_0 : i32
    scf.if %2 {
      %cst_23 = arith.constant 0xFF800000 : f32
      %38 = vector.broadcast %cst_23 : f32 to vector<8x1xf32>
      %c0_24 = arith.constant 0 : index
      %c0_25 = arith.constant 0 : index
      %39 = vector.load %arg6[%c0_24, %c0_25] : memref<8x1xf32, #tpu.memory_space<vmem>>, vector<8x1xf32>
      tpu.vector_store %arg6[%c0_24, %c0_25], %38 {strides = array<i32>} : memref<8x1xf32, #tpu.memory_space<vmem>>, vector<8x1xf32>,
      %cst_26 = arith.constant 0.000000e+00 : f32
      %40 = vector.broadcast %cst_26 : f32 to vector<8x1xf32>
      %c0_27 = arith.constant 0 : index
      %c0_28 = arith.constant 0 : index
      %41 = vector.load %arg7[%c0_27, %c0_28] : memref<8x1xf32, #tpu.memory_space<vmem>>, vector<8x1xf32>
      tpu.vector_store %arg7[%c0_27, %c0_28], %40 {strides = array<i32>} : memref<8x1xf32, #tpu.memory_space<vmem>>, vector<8x1xf32>,
      %cst_29 = arith.constant 0.000000e+00 : f32
      %42 = vector.broadcast %cst_29 : f32 to vector<8x1xf32>
      %c0_30 = arith.constant 0 : index
      %c0_31 = arith.constant 0 : index
      %43 = vector.load %arg8[%c0_30, %c0_31] : memref<8x1xf32, #tpu.memory_space<vmem>>, vector<8x1xf32>
      tpu.vector_store %arg8[%c0_30, %c0_31], %42 {strides = array<i32>} : memref<8x1xf32, #tpu.memory_space<vmem>>, vector<8x1xf32>,
    } else {
    }
    %c0 = arith.constant 0 : index
    %c0_1 = arith.constant 0 : index
    %3 = vector.load %arg2[%c0, %c0_1] : memref<8x128xf32, #tpu.memory_space<vmem>>, vector<8x128xf32>
    %c0_2 = arith.constant 0 : index
    %c0_3 = arith.constant 0 : index
    %4 = vector.load %arg3[%c0_2, %c0_3] : memref<8x1xi32, #tpu.memory_space<vmem>>, vector<8x1xi32>
    %cst = arith.constant dense<0xFF800000> : vector<8xf32>
    %5 = vector.multi_reduction <maximumf>, %3, %cst [1] : vector<8x128xf32> to vector<8xf32>
    %6 = vector.shape_cast %5 : vector<8xf32> to vector<8x1xf32>
    %c0_4 = arith.constant 0 : index
    %c0_5 = arith.constant 0 : index
    %7 = vector.load %arg6[%c0_4, %c0_5] : memref<8x1xf32, #tpu.memory_space<vmem>>, vector<8x1xf32>
    %8 = arith.maximumf %7, %6 : vector<8x1xf32>
    %c0_6 = arith.constant 0 : index
    %c0_7 = arith.constant 0 : index
    %9 = vector.load %arg6[%c0_6, %c0_7] : memref<8x1xf32, #tpu.memory_space<vmem>>, vector<8x1xf32>
    %10 = arith.subf %9, %8 : vector<8x1xf32>
    %11 = math.exp %10 : vector<8x1xf32>
    %c0_8 = arith.constant 0 : index
    %c0_9 = arith.constant 0 : index
    %12 = vector.load %arg7[%c0_8, %c0_9] : memref<8x1xf32, #tpu.memory_space<vmem>>, vector<8x1xf32>
    %13 = arith.mulf %11, %12 : vector<8x1xf32>
    %14 = vector.broadcast %8 : vector<8x1xf32> to vector<8x128xf32>
    %15 = arith.subf %3, %14 : vector<8x128xf32>
    %16 = math.exp %15 : vector<8x128xf32>
    %cst_10 = arith.constant dense<0.000000e+00> : vector<8xf32>
    %17 = vector.multi_reduction <add>, %16, %cst_10 [1] : vector<8x128xf32> to vector<8xf32>
    %18 = vector.shape_cast %17 : vector<8xf32> to vector<8x1xf32>
    %19 = arith.addf %13, %18 : vector<8x1xf32>
    %20 = tpu.iota {dimensions = array<i32: 1>} : vector<8x128xi32>
    %c128_i32 = arith.constant 128 : i32
    %21 = arith.muli %arg1, %c128_i32 : i32
    %22 = vector.broadcast %21 : i32 to vector<8x1xi32>
    %23 = arith.subi %4, %22 : vector<8x1xi32>
    %c0_11 = arith.constant 0 : index
    %c0_12 = arith.constant 0 : index
    %24 = vector.load %arg8[%c0_11, %c0_12] : memref<8x1xf32, #tpu.memory_space<vmem>>, vector<8x1xf32>
    %25 = vector.broadcast %23 : vector<8x1xi32> to vector<8x128xi32>
    %26 = arith.cmpi eq, %20, %25 : vector<8x128xi32>
    %cst_13 = arith.constant 0.000000e+00 : f32
    %27 = vector.broadcast %cst_13 : f32 to vector<8x128xf32>
    %28 = arith.select %26, %3, %27 : vector<8x128xi1>, vector<8x128xf32>
    %cst_14 = arith.constant dense<0.000000e+00> : vector<8xf32>
    %29 = vector.multi_reduction <add>, %28, %cst_14 [1] : vector<8x128xf32> to vector<8xf32>
    %30 = vector.shape_cast %29 : vector<8xf32> to vector<8x1xf32>
    %31 = arith.addf %24, %30 : vector<8x1xf32>
    %c0_15 = arith.constant 0 : index
    %c0_16 = arith.constant 0 : index
    %32 = vector.load %arg6[%c0_15, %c0_16] : memref<8x1xf32, #tpu.memory_space<vmem>>, vector<8x1xf32>
    tpu.vector_store %arg6[%c0_15, %c0_16], %8 {strides = array<i32>} : memref<8x1xf32, #tpu.memory_space<vmem>>, vector<8x1xf32>,
    %c0_17 = arith.constant 0 : index
    %c0_18 = arith.constant 0 : index
    %33 = vector.load %arg7[%c0_17, %c0_18] : memref<8x1xf32, #tpu.memory_space<vmem>>, vector<8x1xf32>
    tpu.vector_store %arg7[%c0_17, %c0_18], %19 {strides = array<i32>} : memref<8x1xf32, #tpu.memory_space<vmem>>, vector<8x1xf32>,
    %c0_19 = arith.constant 0 : index
    %c0_20 = arith.constant 0 : index
    %34 = vector.load %arg8[%c0_19, %c0_20] : memref<8x1xf32, #tpu.memory_space<vmem>>, vector<8x1xf32>
    tpu.vector_store %arg8[%c0_19, %c0_20], %31 {strides = array<i32>} : memref<8x1xf32, #tpu.memory_space<vmem>>, vector<8x1xf32>,
    %c0_i32_21 = arith.constant 0 : i32
    %35 = arith.cmpi eq, %arg1, %c0_i32_21 : i32
    %36 = arith.extui %35 : i1 to i32
    %c0_i32_22 = arith.constant 0 : i32
    %37 = arith.cmpi ne, %36, %c0_i32_22 : i32
    scf.if %37 {
      %38 = math.log %19 : vector<8x1xf32>
      %39 = arith.addf %38, %8 : vector<8x1xf32>
      %40 = arith.subf %39, %31 : vector<8x1xf32>
      %c0_23 = arith.constant 0 : index
      %c0_24 = arith.constant 0 : index
      %41 = vector.load %arg4[%c0_23, %c0_24] : memref<8x1xf32, #tpu.memory_space<vmem>>, vector<8x1xf32>
      tpu.vector_store %arg4[%c0_23, %c0_24], %40 {strides = array<i32>} : memref<8x1xf32, #tpu.memory_space<vmem>>, vector<8x1xf32>,
      %42 = arith.cmpf oge, %31, %8 : vector<8x1xf32>
      %43 = arith.extui %42 : vector<8x1xi1> to vector<8x1xi32>
      %44 = arith.sitofp %43 : vector<8x1xi32> to vector<8x1xf32>
      %c0_25 = arith.constant 0 : index
      %c0_26 = arith.constant 0 : index
      %45 = vector.load %arg5[%c0_25, %c0_26] : memref<8x1xf32, #tpu.memory_space<vmem>>, vector<8x1xf32>
      tpu.vector_store %arg5[%c0_25, %c0_26], %44 {strides = array<i32>} : memref<8x1xf32, #tpu.memory_space<vmem>>, vector<8x1xf32>,
    } else {
    }
    return
  }
  func.func @transform_0(%arg0: i32, %arg1: i32) -> (i32, i32) {
    %c0_i32 = arith.constant 0 : i32
    return %arg0, %arg1 : i32, i32
  }
  func.func @transform_1(%arg0: i32, %arg1: i32) -> (i32, i32) {
    %c0_i32 = arith.constant 0 : i32
    %c0_i32_0 = arith.constant 0 : i32
    return %arg0, %c0_i32 : i32, i32
  }
  func.func @transform_2(%arg0: i32, %arg1: i32) -> (i32, i32) {
    %c0_i32 = arith.constant 0 : i32
    %c0_i32_0 = arith.constant 0 : i32
    return %arg0, %c0_i32 : i32, i32
  }
  func.func @transform_3(%arg0: i32, %arg1: i32) -> (i32, i32) {
    %c0_i32 = arith.constant 0 : i32
    %c0_i32_0 = arith.constant 0 : i32
    return %arg0, %c0_i32 : i32, i32
  }
}

</mosaic_0001>

<bundles_post_ra>
// kernel: classification_loss_and_accuracy.1
= control target key start
LH: loop header
LB: loop body
LE: loop exit
PB: predicated region body
PF: predicated region fallthrough
CT: control target
= control target key end

     0   :  { %vm17_vm0 = vcmask 7168   ;;  %v93_v1 = vmov -inf   ;;  %v94_v2 = vmov 0   ;;  %v95_v4 = vmov 0.0   ;;  %s136_s0 = inlined_call_operand.vmem [shape: f32[8,128], index: 0, kind: input, shape index: {}]   ;;  %s137_s1 = inlined_call_operand.vmem [shape: s32[8,1], index: 1, kind: input, shape index: {}]   ;;  %s138_s3 = inlined_call_operand.vmem [shape: f32[8,1], index: 3, kind: output, shape index: {1}]   ;;  %s139_s2 = inlined_call_operand.vmem [shape: f32[8,1], index: 2, kind: output, shape index: {0}]  }
   0x1   :  { %v21_v0 = vld [vmem:[%s136_s0] sm:$0xff]  ;;  %18 = vst.msk [vmem:[#allocation2] sm:$0xff] %vm17_vm0, %v93_v1  ;;  %85 = vset.pattern.permute.xlu0 %v94_v2  ;;  %86 = vset.pattern.permute.xlu1 %v94_v2  ;;  %19 = vst.msk [vmem:[#allocation3] sm:$0xff] %vm17_vm0, %v95_v4  ;;  %v43_v11 = vlaneseq }
   0x2   :  { %23 = vmax.xlane.f32.xlu0 %v21_v0  ;;  %v22_v3 = vld [vmem:[%s137_s1] sm:$0xff]  ;;  %20 = vst.msk [vmem:[#allocation4] sm:$0xff] %vm17_vm0, %v95_v4 }
   0x3   :  { %50 = vperm.xlu1 %86, %v22_v3   ;;  %v44_v12 = vand.u32 127, %v43_v11 }
   0x8   :  { %v25_v5 = vld [vmem:[#allocation2] sm:$0xff]  ;;  %v30_v19 = vld [vmem:[#allocation3] sm:$0xff] }
   0x9   :  { %v48_v23 = vld [vmem:[#allocation4] sm:$0xff] }
  0x7e   :  { %v51_v13 = vpop.permute.xlu1 %50 }
  0x7f   :  { %vm52_vm1 = vcmp.eq.s32.totalorder %v44_v12, %v51_v13 }
  0x80   :  { %v53_v15 = vsel %vm52_vm1, %v21_v0, 0.0 }
  0x8b   :  { %v24_v6 = vpop.xlane.xlu0 %23 }
  0x8c   :  { %v26_v7 = vmax.f32 %v25_v5, %v24_v6 }
  0x8e   :  { %58 = vst.msk [vmem:[#allocation2] sm:$0xff] %vm17_vm0, %v26_v7  ;;  %34 = vperm.xlu0 %85, %v26_v7   ;;  %v27_v16 = vsub.f32 %v25_v5, %v26_v7 }
  0x90   :  { %v28_v17 = vmul.f32 1.442695, %v27_v16 }
 0x109   :  { %v35_v8 = vpop.permute.xlu0 %34 }
 0x10a   :  { %v37_v9 = vsub.f32 %v21_v0, %v35_v8 }
 0x10c   :  { %v38_v10 = vmul.f32 1.442695, %v37_v9 }
 0x10e   :  { %87 = vpow2.f32 %v38_v10 }
 0x10f   :  { %89 = vpow2.f32 %v28_v17 }
 0x11b   :  { %v88_v14 = vpop.eup %87 }
 0x11c   :  { %40 = vadd.xlane.f32.xlu1 %v88_v14  ;;  %v90_v18 = vpop.eup %89 }
 0x11d   :  { %v31_v20 = vmul.f32 %v90_v18, %v30_v19 }
 0x120   :  { %54 = vadd.xlane.f32.xlu1 %v53_v15 }
 0x1a5   :  { %v41_v21 = vpop.xlane.xlu1 %40 }
 0x1a6   :  { %v42_v22 = vadd.f32 %v41_v21, %v31_v20 }
 0x1a8   :  { %59 = vst.msk [vmem:[#allocation3] sm:$0xff] %vm17_vm0, %v42_v22  ;;  %91 = vlog2.f32 %v42_v22 }
 0x1a9   :  { %v55_v24 = vpop.xlane.xlu1 %54 }
 0x1aa   :  { %v56_v25 = vadd.f32 %v55_v24, %v48_v23 }
 0x1ac   :  { %60 = vst.msk [vmem:[#allocation4] sm:$0xff] %vm17_vm0, %v56_v25  ;;  %vm69_vm2 = vcmp.ge.f32.partialorder %v56_v25, %v26_v7 }
 0x1ad   :  { %v81_v26 = vsel %vm69_vm2, 1.0, %v95_v4 }
 0x1ae   :  { %72 = vst.msk [vmem:[%s138_s3] sm:$0xff] %vm17_vm0, %v81_v26 }
 0x1b5   :  { %v92_v27 = vpop.eup %91 }
 0x1b6   :  { %v65_v28 = vmul.f32 0.6931472, %v92_v27 }
 0x1b8   :  { %v66_v29 = vadd.f32 %v65_v28, %v26_v7 }
 0x1ba   :  { %v67_v30 = vsub.f32 %v66_v29, %v56_v25 }
 0x1bc   :  { %68 = vst.msk [vmem:[%s139_s2] sm:$0xff] %vm17_vm0, %v67_v30 }

</bundles_post_ra>
